<compile_context>
chip_gen: v6e
topology: v6e:2x2x1
jax: 0.10.0
libtpu: 0.0.40
codegen_flags: <defaults>
</compile_context>

<pallas_src>
import jax
import jax.numpy as jnp
from jax.experimental import pallas as pl
from jax.experimental.pallas import tpu as pltpu

IN_DIM = 20
HID_DIM = 400
OUT_DIM = 784


def decoder_kernel(x_ref, w1_ref, b1_ref, w2_ref, b2_ref, o_ref):
    # fc1: bf16 x bf16 matmul on the MXU, f32 accumulation.
    h = jnp.dot(x_ref[...], w1_ref[...], preferred_element_type=jnp.float32)
    h = jnp.maximum(h + b1_ref[...], 0.0)          # bias + ReLU in f32
    # fc2: cast the f32 hidden to bf16 for the MXU, accumulate in f32.
    y = jnp.dot(h.astype(jnp.bfloat16), w2_ref[...],
                preferred_element_type=jnp.float32)
    y = y + b2_ref[...]                            # bias in f32
    # sigmoid = 1 / (1 + exp(-y)); exp + approx reciprocal both hit the EUP
    # slot, leaving VALU free on the store-bound path.
    s = pl.reciprocal(1.0 + jnp.exp(-y), approx=True)
    o_ref[...] = s.astype(o_ref.dtype)             # bf16 store -> 2x less HBM


def _round_up(x, m):
    return ((x + m - 1) // m) * m


def _choose_tile_b(bp, max_tile=512):
    """Largest multiple-of-16 divisor of bp that is <= max_tile, preferring
    ones that leave >= 2 grid steps (so v7x's 2 TensorCores both get work)."""
    best_multi = 0
    best_any = 0
    t = 16
    while t <= min(bp, max_tile):
        if bp % t == 0:
            best_any = t
            if bp // t >= 2:
                best_multi = t
        t += 16
    if best_multi:
        return best_multi
    return best_any if best_any else bp


def decoder_forward(x, w1, b1, w2, b2, *, tile_b=None, out_dtype=jnp.bfloat16):
    """x: (B, 20) -> (B, 784).

    w1: (20, 400), b1: (400,), w2: (400, 784), b2: (784,)
    (weights already transposed relative to PyTorch's (out, in) storage).
    Returns bf16 by default (output HBM write dominates; post-sigmoid values
    keep ~3 decimal digits).  Pass out_dtype=jnp.float32 for an f32 result.
    """
    B = x.shape[0]

    if tile_b is None:
        Bp = _round_up(max(B, 1), 16)
        tile_b = _choose_tile_b(Bp)
    else:
        Bp = _round_up(max(B, 1), tile_b)

    # Pre-cast x to bf16 (halves x DMA, removes in-kernel cast); pad batch
    # only to the sublane/tile multiple (usually Bp == B for sane batches).
    x_p = x.astype(jnp.bfloat16)
    if Bp != B:
        x_p = jnp.pad(x_p, ((0, Bp - B), (0, 0)))

    # bf16 weights (halve HBM traffic, 2x MXU rate); biases stay f32.
    w1_b = w1.astype(jnp.bfloat16)
    w2_b = w2.astype(jnp.bfloat16)
    b1_2d = b1.reshape(1, HID_DIM).astype(jnp.float32)
    b2_2d = b2.reshape(1, OUT_DIM).astype(jnp.float32)

    grid = (Bp // tile_b,)
    out = pl.pallas_call(
        decoder_kernel,
        out_shape=jax.ShapeDtypeStruct((Bp, OUT_DIM), jnp.bfloat16),
        grid_spec=pl.GridSpec(
            grid=grid,
            in_specs=[
                # x: tiled over batch, double-buffered by the pipeline.
                pl.BlockSpec((tile_b, IN_DIM), lambda i: (i, 0)),
                # Weights / biases: constant block index -> DMA'd once,
                # VMEM-resident for the whole grid.
                pl.BlockSpec((IN_DIM, HID_DIM), lambda i: (0, 0)),
                pl.BlockSpec((1, HID_DIM), lambda i: (0, 0)),
                pl.BlockSpec((HID_DIM, OUT_DIM), lambda i: (0, 0)),
                pl.BlockSpec((1, OUT_DIM), lambda i: (0, 0)),
            ],
            out_specs=pl.BlockSpec((tile_b, OUT_DIM), lambda i: (i, 0)),
        ),
        compiler_params=pltpu.CompilerParams(
            dimension_semantics=("parallel",)),
    )(x_p, w1_b, b1_2d, w2_b, b2_2d)

    if Bp != B:
        out = out[:B]          # contiguous row slice; identity when Bp == B
    if out_dtype != jnp.bfloat16:
        out = out.astype(out_dtype)
    return out


def init_params(key):
    """Deterministic PyTorch-like init (uniform +/- 1/sqrt(fan_in))."""
    k1, k2, k3, k4 = jax.random.split(key, 4)
    lim1 = 1.0 / jnp.sqrt(float(IN_DIM))
    lim2 = 1.0 / jnp.sqrt(float(HID_DIM))
    # Stored already transposed: (in, out)
    w1 = jax.random.uniform(k1, (IN_DIM, HID_DIM), jnp.float32, -lim1, lim1)
    b1 = jax.random.uniform(k2, (HID_DIM,), jnp.float32, -lim1, lim1)
    w2 = jax.random.uniform(k3, (HID_DIM, OUT_DIM), jnp.float32, -lim2, lim2)
    b2 = jax.random.uniform(k4, (OUT_DIM,), jnp.float32, -lim2, lim2)
    return w1, b1, w2, b2


def _reference(x, w1, b1, w2, b2):
    return jax.nn.sigmoid(jnp.maximum(x @ w1 + b1, 0.0) @ w2 + b2)


if __name__ == "__main__":
    key = jax.random.PRNGKey(0)
    kx, kx2, kp = jax.random.split(key, 3)
    w1, b1, w2, b2 = init_params(kp)

    # Small batch (single 16-row padded tile).
    batch = 8
    x = jax.random.normal(kx, (batch, IN_DIM), jnp.float32)
    out = jax.block_until_ready(decoder_forward(x, w1, b1, w2, b2))
    ref = _reference(x, w1, b1, w2, b2)
    assert out.shape == (batch, OUT_DIM)
    # bf16 weights + bf16 output store: post-sigmoid error is well under 1e-2.
    assert jnp.allclose(out.astype(jnp.float32), ref, atol=1e-2, rtol=1e-2)

    # Larger batch: 384 -> tile_b=192, grid=(2,) (no batch padding, exercises
    # the multi-block pipeline / megacore path).
    batch2 = 384
    x2 = jax.random.normal(kx2, (batch2, IN_DIM), jnp.float32)
    out2 = jax.block_until_ready(decoder_forward(x2, w1, b1, w2, b2))
    ref2 = _reference(x2, w1, b1, w2, b2)
    assert out2.shape == (batch2, OUT_DIM)
    assert jnp.allclose(out2.astype(jnp.float32), ref2, atol=1e-2, rtol=1e-2)

    print("KERNEL_OK")
</pallas_src>

<mosaic_0001>
module attributes {stable_mosaic.version = 11 : i64} {
  func.func @decoder_kernel(%arg0: i32, %arg1: memref<16x20xbf16, #tpu.memory_space<vmem>>, %arg2: memref<20x400xbf16, #tpu.memory_space<vmem>>, %arg3: memref<1x400xf32, #tpu.memory_space<vmem>>, %arg4: memref<400x784xbf16, #tpu.memory_space<vmem>>, %arg5: memref<1x784xf32, #tpu.memory_space<vmem>>, %arg6: memref<16x784xbf16, #tpu.memory_space<vmem>>) attributes {dimension_semantics = [#tpu.dimension_semantics<parallel>], iteration_bounds = array<i64: 1>, scalar_prefetch = 0 : i64, scratch_operands = 0 : i64, tpu.core_type = #tpu.core_type<tc>, window_params = [{transform_indices = @transform_0, window_bounds = array<i64: 16, 20>}, {pipeline_mode = #tpu.pipeline_mode<synchronous>, transform_indices = @transform_1, window_bounds = array<i64: 20, 400>}, {pipeline_mode = #tpu.pipeline_mode<synchronous>, transform_indices = @transform_2, window_bounds = array<i64: 1, 400>}, {pipeline_mode = #tpu.pipeline_mode<synchronous>, transform_indices = @transform_3, window_bounds = array<i64: 400, 784>}, {pipeline_mode = #tpu.pipeline_mode<synchronous>, transform_indices = @transform_4, window_bounds = array<i64: 1, 784>}, {transform_indices = @transform_5, window_bounds = array<i64: 16, 784>}]} {
    %c0 = arith.constant 0 : index
    %c0_0 = arith.constant 0 : index
    %0 = vector.load %arg1[%c0, %c0_0] : memref<16x20xbf16, #tpu.memory_space<vmem>>, vector<16x20xbf16>
    %c0_1 = arith.constant 0 : index
    %c0_2 = arith.constant 0 : index
    %1 = vector.load %arg2[%c0_1, %c0_2] : memref<20x400xbf16, #tpu.memory_space<vmem>>, vector<20x400xbf16>
    %cst = arith.constant dense<0.000000e+00> : vector<16x400xf32>
    %2 = tpu.matmul %0, %1, %cst {dimension_numbers = #tpu.dot_dimension_numbers<[1], [0], [0], [1], [0, 0, 1, 1], [], []>} : vector<16x20xbf16>, vector<20x400xbf16>, vector<16x400xf32> -> vector<16x400xf32>
    %c0_3 = arith.constant 0 : index
    %c0_4 = arith.constant 0 : index
    %3 = vector.load %arg3[%c0_3, %c0_4] : memref<1x400xf32, #tpu.memory_space<vmem>>, vector<1x400xf32>
    %4 = vector.broadcast %3 : vector<1x400xf32> to vector<16x400xf32>
    %5 = arith.addf %2, %4 : vector<16x400xf32>
    %cst_5 = arith.constant 0.000000e+00 : f32
    %6 = vector.broadcast %cst_5 : f32 to vector<16x400xf32>
    %7 = arith.maximumf %5, %6 : vector<16x400xf32>
    %8 = arith.truncf %7 : vector<16x400xf32> to vector<16x400xbf16>
    %c0_6 = arith.constant 0 : index
    %c0_7 = arith.constant 0 : index
    %9 = vector.load %arg4[%c0_6, %c0_7] : memref<400x784xbf16, #tpu.memory_space<vmem>>, vector<400x784xbf16>
    %cst_8 = arith.constant dense<0.000000e+00> : vector<16x784xf32>
    %10 = tpu.matmul %8, %9, %cst_8 {dimension_numbers = #tpu.dot_dimension_numbers<[1], [0], [0], [1], [0, 0, 1, 1], [], []>} : vector<16x400xbf16>, vector<400x784xbf16>, vector<16x784xf32> -> vector<16x784xf32>
    %c0_9 = arith.constant 0 : index
    %c0_10 = arith.constant 0 : index
    %11 = vector.load %arg5[%c0_9, %c0_10] : memref<1x784xf32, #tpu.memory_space<vmem>>, vector<1x784xf32>
    %12 = vector.broadcast %11 : vector<1x784xf32> to vector<16x784xf32>
    %13 = arith.addf %10, %12 : vector<16x784xf32>
    %cst_11 = arith.constant 0.000000e+00 : f32
    %14 = vector.broadcast %cst_11 : f32 to vector<16x784xf32>
    %15 = arith.subf %14, %13 : vector<16x784xf32>
    %16 = math.exp %15 : vector<16x784xf32>
    %cst_12 = arith.constant 1.000000e+00 : f32
    %17 = vector.broadcast %cst_12 : f32 to vector<16x784xf32>
    %18 = arith.addf %17, %16 : vector<16x784xf32>
    %19 = tpu.reciprocal %18 {approx = true} : vector<16x784xf32> -> vector<16x784xf32>
    %20 = arith.truncf %19 : vector<16x784xf32> to vector<16x784xbf16>
    %c0_13 = arith.constant 0 : index
    %c0_14 = arith.constant 0 : index
    %21 = vector.load %arg6[%c0_13, %c0_14] : memref<16x784xbf16, #tpu.memory_space<vmem>>, vector<16x784xbf16>
    tpu.vector_store %arg6[%c0_13, %c0_14], %20 {strides = array<i32>} : memref<16x784xbf16, #tpu.memory_space<vmem>>, vector<16x784xbf16>,
    return
  }
  func.func @transform_0(%arg0: i32) -> (i32, i32) {
    %c0_i32 = arith.constant 0 : i32
    %c0_i32_0 = arith.constant 0 : i32
    return %arg0, %c0_i32 : i32, i32
  }
  func.func @transform_1(%arg0: i32) -> (i32, i32) {
    %c0_i32 = arith.constant 0 : i32
    %c0_i32_0 = arith.constant 0 : i32
    %c0_i32_1 = arith.constant 0 : i32
    return %c0_i32, %c0_i32_0 : i32, i32
  }
  func.func @transform_2(%arg0: i32) -> (i32, i32) {
    %c0_i32 = arith.constant 0 : i32
    %c0_i32_0 = arith.constant 0 : i32
    %c0_i32_1 = arith.constant 0 : i32
    return %c0_i32, %c0_i32_0 : i32, i32
  }
  func.func @transform_3(%arg0: i32) -> (i32, i32) {
    %c0_i32 = arith.constant 0 : i32
    %c0_i32_0 = arith.constant 0 : i32
    %c0_i32_1 = arith.constant 0 : i32
    return %c0_i32, %c0_i32_0 : i32, i32
  }
  func.func @transform_4(%arg0: i32) -> (i32, i32) {
    %c0_i32 = arith.constant 0 : i32
    %c0_i32_0 = arith.constant 0 : i32
    %c0_i32_1 = arith.constant 0 : i32
    return %c0_i32, %c0_i32_0 : i32, i32
  }
  func.func @transform_5(%arg0: i32) -> (i32, i32) {
    %c0_i32 = arith.constant 0 : i32
    %c0_i32_0 = arith.constant 0 : i32
    return %arg0, %c0_i32 : i32, i32
  }
}

</mosaic_0001>

<bundles_post_ra>
// kernel: tpu_custom_call.1
= control target key start
LH: loop header
LB: loop body
LE: loop exit
PB: predicated region body
PF: predicated region fallthrough
CT: control target
= control target key end

     0   :  { %10 = vsyncpa [#allocation3], 0  ;;  %s2690_s0 = inlined_call_operand.hbm [shape: bf16[16,20], index: 0, kind: input, shape index: {}]   ;;  %s2691_s1 = inlined_call_operand.hbm [shape: bf16[20,400], index: 1, kind: input, shape index: {}]   ;;  %s2692_s2 = inlined_call_operand.hbm [shape: f32[1,400], index: 2, kind: input, shape index: {}]   ;;  %s2693_s3 = inlined_call_operand.hbm [shape: bf16[400,784], index: 3, kind: input, shape index: {}]   ;;  %s2694_s4 = inlined_call_operand.vmem [shape: f32[1,784], index: 4, kind: input, shape index: {}]   ;;  %s2695_s5 = inlined_call_operand.hbm [shape: bf16[16,784], index: 5, kind: output, shape index: {}]  }
   0x1   :  { %11 = vsyncpa [#allocation6], 0 }
   0x2   :  { %12 = vsyncpa [#allocation9], 0 }
   0x3   :  { %13 = vsyncpa [#allocation4], 0  ;;  %s2545_s18 = smov [#allocation5]  }
   0x4   :  { %s31_s19 = sshll.u32 %s2545_s18, 4  ;;  %s32_s19 = int_to_ptr.vmem [resolvable:$true] %s31_s19 }
   0x5   :  { %s2445_s20 = scalar_lea.vmem %s32_s19, 768  ;;  %p2450_p1 = scmp.lt.s32.totalorder %s32_s19, %s32_s19 }
   0x6   :  { %p2446_p0 = scmp.ne.s32.totalorder %s32_s19, %s2445_s20  ;;  %p2451_p2 = scmp.lt.s32.totalorder %s2445_s20, %s2445_s20 }
   0x8   :  { %p2452_p3 = por %p2451_p2, %p2450_p1 }
   0xa   :  { %p2453_p4 = pnand %p2452_p3, %p2446_p0 }
   0xc   :  { %2456 = shalt.err (!%p2453_p4)
}
   0xd   :  { %s2546_s21 = smov 256   ;;  %s2547_s22 = smov 16  }
   0xe   :  { %37 = dma.hbm_to_vmem [thread:$0]  %s2691_s1, 768, %s32_s19, [#allocation6], %s2546_s21, %s2546_s21, %s2547_s22  }
   0xf   :  { %s2548_s25 = smov [#allocation2]  }
  0x10   :  { %s19_s26 = sshll.u32 %s2548_s25, 4  ;;  %s20_s26 = int_to_ptr.vmem [resolvable:$true] %s19_s26 }
  0x11   :  { %s2465_s27 = scalar_lea.vmem %s20_s26, 128  ;;  %p2470_p6 = scmp.lt.s32.totalorder %s20_s26, %s20_s26 }
  0x12   :  { %p2466_p5 = scmp.ne.s32.totalorder %s20_s26, %s2465_s27  ;;  %p2471_p7 = scmp.lt.s32.totalorder %s2465_s27, %s2465_s27 }
  0x14   :  { %p2472_p8 = por %p2471_p7, %p2470_p6 }
  0x16   :  { %p2473_p9 = pnand %p2472_p8, %p2466_p5 }
  0x18   :  { %2476 = shalt.err (!%p2473_p9)
}
  0x19   :  { %s2549_s28 = smov 64   ;;  %s2550_s29 = smov 4  }
  0x1a   :  { %25 = dma.hbm_to_vmem [thread:$0]  %s2690_s0, 128, %s20_s26, [#allocation3], %s2549_s28, %s2549_s28, %s2550_s29  }
  0x1b   :  { %s2551_s7 = smov [#allocation7]   ;;  %s2552_s9 = smov [#allocation8]  }
  0x1c   :  { %s44_s8 = sshll.u32 %s2551_s7, 4  ;;  %s53_s1 = sshll.u32 %s2552_s9, 4  ;;  %s45_s8 = int_to_ptr.vmem [resolvable:$true] %s44_s8  ;;  %s54_s1 = int_to_ptr.vmem [resolvable:$true] %s53_s1 }
  0x1d   :  { %s2485_s10 = scalar_lea.vmem %s45_s8, 64  ;;  %p2490_p11 = scmp.lt.s32.totalorder %s45_s8, %s45_s8 }
  0x1e   :  { %p2486_p10 = scmp.ne.s32.totalorder %s45_s8, %s2485_s10  ;;  %p2491_p12 = scmp.lt.s32.totalorder %s2485_s10, %s2485_s10 }
  0x20   :  { %p2492_p13 = por %p2491_p12, %p2490_p11 }
  0x22   :  { %p2493_p0 = pnand %p2492_p13, %p2486_p10 }
  0x24   :  { %2496 = shalt.err (!%p2493_p0)
}
  0x25   :  { %47 = dma.hbm_to_vmem [thread:$0]  %s2692_s2, 64, %s45_s8, [#allocation6]  }
  0x26   :  { %s2505_s13 = scalar_lea.vmem %s54_s1, 22400  ;;  %p2510_p2 = scmp.lt.s32.totalorder %s54_s1, %s54_s1 }
  0x27   :  { %p2506_p1 = scmp.ne.s32.totalorder %s54_s1, %s2505_s13  ;;  %p2511_p3 = scmp.lt.s32.totalorder %s2505_s13, %s2505_s13 }
  0x29   :  { %p2512_p4 = por %p2511_p3, %p2510_p2 }
  0x2b   :  { %p2513_p5 = pnand %p2512_p4, %p2506_p1 }
  0x2d   :  { %2516 = shalt.err (!%p2513_p5)
}
  0x2e   :  { %s2553_s0 = smov 448   ;;  %s2554_s14 = smov 28  }
  0x2f   :  { %59 = dma.hbm_to_vmem [thread:$0]  %s2693_s3, 22400, %s54_s1, [#allocation9], %s2553_s0, %s2553_s0, %s2554_s14  }
  0x30   :  { %2537 = dma.done.wait [#allocation3], 128  }
  0x31   :  { %2538 = vsyncadd [#allocation3], 4294967168 }
  0x32   :  { %2539 = dma.done.wait [#allocation6], 832  }
  0x33   :  { %2540 = vsyncadd [#allocation6], 4294966464 }
  0x34   :  { %2541 = dma.done.wait [#allocation9], 22400  }
  0x35   :  { %2542 = vsyncadd [#allocation9], 4294944896  ;;  %v2555_v0 = vmov 0   ;;  %v81_v1 = vld [vmem:[#allocation5 + $0x20] sm:$0x33]  ;;  %vm144_vm0 = vcmask 1041408  }
  0x36   :  { %189 = vmatprep.mubr.bf16.mxu1 %v2555_v0  ;;  %v1884_v2 = vcombine.high %v81_v1, %v81_v1  ;;  %v1883_v3 = vcombine.low %v81_v1, %v81_v1  ;;  %v2122_v4 = vld [vmem:[#allocation5 + $0x4] ss:$16 sps:$4 sm:$0xff]   ;;  %v82_v5 = vld [vmem:[#allocation5 + $0x28] sm:$0x33]  ;;  %v2124_v7 = vld [vmem:[#allocation5] ss:$16 sps:$4 sm:$0xff]  }
  0x37   :  { %v1886_v8 = vcombine.high %v82_v5, %v82_v5  ;;  %v1885_v9 = vcombine.low %v82_v5, %v82_v5  ;;  %v2131_v10 = vld [vmem:[#allocation8 + $0x18c] ss:$28 sps:$4 sm:$0xff]   ;;  %v2134_v12 = vld [vmem:[#allocation8 + $0x154] ss:$28 sps:$4 sm:$0xff]   ;;  %vm140_vm1 = vcmask 162816   ;;  %vm1392_vm2 = vcmask 130048  }
  0x38   :  { %1887 = vmatprep.subr.msk.bf16.mxu1 %vm144_vm0, %v1884_v2  ;;  %v146_v6 = vsel %vm144_vm0, %v1883_v3, 0  ;;  %v2133_v11 = vld [vmem:[#allocation8 + $0x188] ss:$28 sps:$4 sm:$0xff]   ;;  %1396 = vmatprep.subr.bf16.mxu0 %v2131_v10  ;;  %v2136_v16 = vld [vmem:[#allocation8 + $0x150] ss:$28 sps:$4 sm:$0xff]   ;;  %v85_v3 = vlaneseq  ;;  %vm1853_vm3 = vcmask 125952  }
  0x39   :  { %170 = vmatpush1.bf16.msra.mxu1 %v146_v6  ;;  %v2125_v13 = vld [vmem:[#allocation2] sm:$0xff]   ;;  %1397 = vmatpush1.bf16.msra.mxu0 %v2133_v11  ;;  %v152_v14 = vsel %vm144_vm0, %v1885_v9, 0  ;;  %v2137_v17 = vld [vmem:[#allocation8 + $0x11c] ss:$28 sps:$4 sm:$0xff]   ;;  %v2166_v26 = vld [vmem:[#allocation8 + $0x4d0] ss:$28 sps:$4 sm:$0xff]  }
  0x3a   :  { %171 = vmatprep.subr.bf16.mxu1 %v2122_v4  ;;  %v2130_v15 = vld [vmem:[#allocation5 + $0xc] ss:$16 sps:$4 sm:$0xff]   ;;  %1398 = vmatprep.subr.bf16.mxu0 %v2134_v12  ;;  %v2128_v18 = vld [vmem:[#allocation5 + $0x8] ss:$16 sps:$4 sm:$0xff]   ;;  %v2142_v21 = vld [vmem:[#allocation8 + $0xe0] ss:$28 sps:$4 sm:$0xff]  }
  0x3b   :  { %v2139_v19 = vld [vmem:[#allocation8 + $0x118] ss:$28 sps:$4 sm:$0xff]   ;;  %v2140_v20 = vld [vmem:[#allocation8 + $0xe4] ss:$28 sps:$4 sm:$0xff]   ;;  %v2143_v22 = vld [vmem:[#allocation8 + $0xac] ss:$28 sps:$4 sm:$0xff]  }
  0x3c   :  { %v2160_v23 = vld [vmem:[#allocation8 + $0x508] ss:$28 sps:$4 sm:$0xff]   ;;  %v2168_v27 = vld [vmem:[#allocation8 + $0x4d4] ss:$28 sps:$4 sm:$0xff]   ;;  %v2174_v29 = vld [vmem:[#allocation8 + $0x49c] ss:$28 sps:$4 sm:$0xff]  }
  0x3d   :  { %172 = vmatpush1.bf16.msra.mxu1 %v2124_v7  ;;  %1399 = vmatpush1.bf16.msra.mxu0 %v2136_v16  ;;  %v2162_v24 = vld [vmem:[#allocation8 + $0x50c] ss:$28 sps:$4 sm:$0xff]   ;;  %v2146_v28 = vld [vmem:[#allocation8 + $0x74] ss:$28 sps:$4 sm:$0xff]   ;;  %v2149_v32 = vld [vmem:[#allocation8 + $0x3c] ss:$28 sps:$4 sm:$0xff]  }
  0x3e   :  { %1889 = vmatprep.subr.msk.bf16.mxu1 %vm144_vm0, %v1886_v8  ;;  %1400 = vmatprep.subr.bf16.mxu0 %v2137_v17  ;;  %v2145_v25 = vld [vmem:[#allocation8 + $0xa8] ss:$28 sps:$4 sm:$0xff]   ;;  %v2148_v30 = vld [vmem:[#allocation8 + $0x70] ss:$28 sps:$4 sm:$0xff]   ;;  %v2172_v31 = vld [vmem:[#allocation8 + $0x498] ss:$28 sps:$4 sm:$0xff]  }
  0x3f   :  { %v2180_v33 = vld [vmem:[#allocation8 + $0x464] ss:$28 sps:$4 sm:$0xff]   ;;  %v2151_v34 = vld [vmem:[#allocation8 + $0x38] ss:$28 sps:$4 sm:$0xff]   ;;  %v2155_v38 = vld [vmem:[#allocation8 + $0x34c] ss:$28 sps:$4 sm:$0xff]  }
  0x40   :  { %1888 = vmatmul.mubr.msk.bf16.vlgmr.msra.gmra.mxu1 %vm140_vm1, %v2125_v13  ;;  %v2178_v35 = vld [vmem:[#allocation8 + $0x460] ss:$28 sps:$4 sm:$0xff]   ;;  %v2157_v39 = vld [vmem:[#allocation8 + $0x348] ss:$28 sps:$4 sm:$0xff]   ;;  %v2158_v40 = vld [vmem:[#allocation8 + $0x314] ss:$28 sps:$4 sm:$0xff]  }
  0x41   :  { %213 = vmatpush1.bf16.msra.mxu1 %v152_v14  ;;  %232 = vmatprep.mubr.bf16.mxu1 %v2555_v0  ;;  %v2152_v36 = vld [vmem:[#allocation8 + $0x4] ss:$28 sps:$4 sm:$0xff]   ;;  %v2163_v41 = vld [vmem:[#allocation8 + $0x310] ss:$28 sps:$4 sm:$0xff]   ;;  %v2164_v42 = vld [vmem:[#allocation8 + $0x2dc] ss:$28 sps:$4 sm:$0xff]  }
  0x42   :  { %214 = vmatprep.subr.bf16.mxu1 %v2130_v15  ;;  %1401 = vmatpush1.bf16.msra.mxu0 %v2139_v19  ;;  %v2154_v37 = vld [vmem:[#allocation8] ss:$28 sps:$4 sm:$0xff]   ;;  %v2169_v43 = vld [vmem:[#allocation8 + $0x2d8] ss:$28 sps:$4 sm:$0xff]   ;;  %v2176_v46 = vld [vmem:[#allocation8 + $0x26c] ss:$28 sps:$4 sm:$0xff]  }
  0x43   :  { %1402 = vmatprep.subr.bf16.mxu0 %v2140_v20  ;;  %v2170_v44 = vld [vmem:[#allocation8 + $0x2a4] ss:$28 sps:$4 sm:$0xff]   ;;  %v2182_v48 = vld [vmem:[#allocation8 + $0x234] ss:$28 sps:$4 sm:$0xff]   ;;  %v2186_v49 = vld [vmem:[#allocation8 + $0x42c] ss:$28 sps:$4 sm:$0xff]  }
  0x44   :  { %v2175_v45 = vld [vmem:[#allocation8 + $0x2a0] ss:$28 sps:$4 sm:$0xff]   ;;  %v2181_v47 = vld [vmem:[#allocation8 + $0x268] ss:$28 sps:$4 sm:$0xff]   ;;  %v2187_v51 = vld [vmem:[#allocation8 + $0x230] ss:$28 sps:$4 sm:$0xff]  }
  0x45   :  { %215 = vmatpush1.bf16.msra.mxu1 %v2128_v18  ;;  %v2184_v50 = vld [vmem:[#allocation8 + $0x428] ss:$28 sps:$4 sm:$0xff]   ;;  %v2188_v52 = vld [vmem:[#allocation8 + $0x1fc] ss:$28 sps:$4 sm:$0xff]   ;;  %v2192_v53 = vld [vmem:[#allocation8 + $0x3f4] ss:$28 sps:$4 sm:$0xff]  }
  0x46   :  { %1439 = vmatprep.subr.bf16.mxu1 %v2162_v24  ;;  %1403 = vmatpush1.bf16.msra.mxu0 %v2142_v21  ;;  %v2190_v54 = vld [vmem:[#allocation8 + $0x3f0] ss:$28 sps:$4 sm:$0xff]   ;;  %v2193_v55 = vld [vmem:[#allocation8 + $0x1f8] ss:$28 sps:$4 sm:$0xff]   ;;  %v2194_v56 = vld [vmem:[#allocation8 + $0x1c4] ss:$28 sps:$4 sm:$0xff]  }
  0x47   :  { %1404 = vmatprep.subr.bf16.mxu0 %v2143_v22  ;;  %v2198_v57 = vld [vmem:[#allocation8 + $0x3bc] ss:$28 sps:$4 sm:$0xff]   ;;  %v2202_v60 = vld [vmem:[#allocation8 + $0x384] ss:$28 sps:$4 sm:$0xff]   ;;  %v2205_v61 = vld [vmem:[#allocation8 + $0x514] ss:$28 sps:$4 sm:$0xff]  }
  0x48   :  { %1890 = vmatmul.mubr.msk.bf16.vlgmr.msra.gmra.mxu1 %vm140_vm1, %v2125_v13  ;;  %v2196_v58 = vld [vmem:[#allocation8 + $0x3b8] ss:$28 sps:$4 sm:$0xff]   ;;  %v2199_v59 = vld [vmem:[#allocation8 + $0x1c0] ss:$28 sps:$4 sm:$0xff]   ;;  %v2610_v4 = vshrl.u32 %v85_v3, 7 }
  0x49   :  { %1440 = vmatpush1.bf16.msra.mxu1 %v2160_v23  ;;  %v2200_v62 = vld [vmem:[#allocation8 + $0x380] ss:$28 sps:$4 sm:$0xff]   ;;  %v2214_v2 = vld [vmem:[#allocation8 + $0x194] ss:$28 sps:$4 sm:$0xff]  }
  0x4a   :  { %1441 = vmatprep.subr.bf16.mxu1 %v2168_v27  ;;  %1405 = vmatpush1.bf16.msra.mxu0 %v2145_v25  ;;  %v2208_v63 = vld [vmem:[#allocation8 + $0x544] ss:$28 sps:$4 sm:$0xff]   ;;  %v91_v5 = vsub.s32 1, %v2610_v4  ;;  %v87_v6 = vsub.s32 0, %v2610_v4  ;;  %v83_v7 = vld [vmem:[#allocation7] sm:$0xf] }
  0x4b   :  { %1406 = vmatprep.subr.bf16.mxu0 %v2146_v28  ;;  %v2206_v1 = vld [vmem:[#allocation8 + $0x540] ss:$28 sps:$4 sm:$0xff]   ;;  %v99_v15 = vsub.s32 3, %v2610_v4  ;;  %v95_v18 = vsub.s32 2, %v2610_v4  ;;  %v2242_v3 = vld [vmem:[#allocation8 + $0x78] ss:$28 sps:$4 sm:$0xff]  }
  0x4c   :  { %v92_v9 = vrot.slane %v83_v7, %v91_v5  ;;  %v88_v10 = vrot.slane %v83_v7, %v87_v6 }
  0x4d   :  { %1442 = vmatpush1.bf16.msra.mxu1 %v2166_v26  ;;  %v100_v24 = vrot.slane %v83_v7, %v99_v15  ;;  %v96_v26 = vrot.slane %v83_v7, %v95_v18  ;;  %v2245_v7 = vld [vmem:[#allocation8 + $0x388] ss:$28 sps:$4 sm:$0xff]  }
  0x4e   :  { %1443 = vmatprep.subr.bf16.mxu1 %v2174_v29  ;;  %1407 = vmatpush1.bf16.msra.mxu0 %v2148_v30  ;;  %v2203_v29 = vld [vmem:[#allocation8 + $0x510] ss:$28 sps:$4 sm:$0xff]  }
  0x4f   :  { %1408 = vmatprep.subr.bf16.mxu0 %v2149_v32  ;;  %v2211_v32 = vld [vmem:[#allocation8 + $0x4dc] ss:$28 sps:$4 sm:$0xff]  }
  0x51   :  { %1444 = vmatpush1.bf16.msra.mxu1 %v2172_v31 }
  0x52   :  { %1445 = vmatprep.subr.bf16.mxu1 %v2180_v33  ;;  %1409 = vmatpush1.bf16.msra.mxu0 %v2151_v34 }
  0x53   :  { %1410 = vmatprep.subr.bf16.mxu0 %v2152_v36 }
  0x55   :  { %1446 = vmatpush1.bf16.msra.mxu1 %v2178_v35 }
  0x56   :  { %1411 = vmatpush1.bf16.msra.mxu0 %v2154_v37  ;;  %1447 = vmatprep.subr.bf16.mxu1 %v2186_v49  ;;  %v2223_v49 = vld [vmem:[#allocation8 + $0x46c] ss:$28 sps:$4 sm:$0xff]  }
  0x57   :  { %1412 = vmatprep.subr.bf16.mxu0 %v2155_v38  ;;  %v2209_v38 = vld [vmem:[#allocation8 + $0x4d8] ss:$28 sps:$4 sm:$0xff]  }
  0x59   :  { %1448 = vmatpush1.bf16.msra.mxu1 %v2184_v50  ;;  %v2218_v50 = vld [vmem:[#allocation8 + $0x158] ss:$28 sps:$4 sm:$0xff]  }
  0x5a   :  { %1413 = vmatpush2.bf16.msra.mxu0 %v2157_v39  ;;  %1449 = vmatprep.subr.bf16.mxu1 %v2192_v53  ;;  %v2229_v53 = vld [vmem:[#allocation8 + $0x434] ss:$28 sps:$4 sm:$0xff]  }
  0x5b   :  { %1414 = vmatprep.subr.bf16.mxu0 %v2158_v40  ;;  %v2217_v40 = vld [vmem:[#allocation8 + $0x4a4] ss:$28 sps:$4 sm:$0xff]  }
  0x5d   :  { %1450 = vmatpush1.bf16.msra.mxu1 %v2190_v54  ;;  %v2224_v54 = vld [vmem:[#allocation8 + $0x120] ss:$28 sps:$4 sm:$0xff]  }
  0x5e   :  { %1415 = vmatpush2.bf16.msra.mxu0 %v2163_v41  ;;  %1451 = vmatprep.subr.bf16.mxu1 %v2198_v57  ;;  %v2235_v57 = vld [vmem:[#allocation8 + $0x3fc] ss:$28 sps:$4 sm:$0xff]  }
  0x5f   :  { %1416 = vmatprep.subr.bf16.mxu0 %v2164_v42 }
  0x61   :  { %1452 = vmatpush1.bf16.msra.mxu1 %v2196_v58  ;;  %v2230_v58 = vld [vmem:[#allocation8 + $0xe8] ss:$28 sps:$4 sm:$0xff]  }
  0x62   :  { %1417 = vmatpush2.bf16.msra.mxu0 %v2169_v43  ;;  %1453 = vmatprep.subr.bf16.mxu1 %v2202_v60  ;;  %v2238_v60 = vld [vmem:[#allocation8 + $0xb4] ss:$28 sps:$4 sm:$0xff]  }
  0x63   :  { %1418 = vmatprep.subr.bf16.mxu0 %v2170_v44 }
  0x65   :  { %1454 = vmatpush1.bf16.msra.mxu1 %v2200_v62  ;;  %v2236_v62 = vld [vmem:[#allocation8 + $0xb0] ss:$28 sps:$4 sm:$0xff]  }
  0x66   :  { %1419 = vmatpush2.bf16.msra.mxu0 %v2175_v45  ;;  %1469 = vmatprep.subr.bf16.mxu1 %v2208_v63  ;;  %v2212_v45 = vld [vmem:[#allocation8 + $0x190] ss:$28 sps:$4 sm:$0xff]   ;;  %v2239_v63 = vld [vmem:[#allocation8 + $0x3c0] ss:$28 sps:$4 sm:$0xff]  }
  0x67   :  { %1420 = vmatprep.subr.bf16.mxu0 %v2176_v46  ;;  %v2215_v46 = vld [vmem:[#allocation8 + $0x4a0] ss:$28 sps:$4 sm:$0xff]  }
  0x69   :  { %1470 = vmatpush2.bf16.msra.mxu1 %v2206_v1  ;;  %v2244_v1 = vld [vmem:[#allocation8 + $0x7c] ss:$28 sps:$4 sm:$0xff]  }
  0x6a   :  { %1421 = vmatpush2.bf16.msra.mxu0 %v2181_v47  ;;  %1482 = vmatprep.subr.bf16.mxu1 %v2214_v2  ;;  %v2247_v2 = vld [vmem:[#allocation8 + $0x38c] ss:$28 sps:$4 sm:$0xff]  }
  0x6b   :  { %1422 = vmatprep.subr.bf16.mxu0 %v2182_v48  ;;  %v2220_v48 = vld [vmem:[#allocation8 + $0x15c] ss:$28 sps:$4 sm:$0xff]  }
  0x6e   :  { %1423 = vmatpush2.bf16.msra.mxu0 %v2187_v51  ;;  %v2221_v51 = vld [vmem:[#allocation8 + $0x468] ss:$28 sps:$4 sm:$0xff]  }
  0x6f   :  { %1424 = vmatprep.subr.bf16.mxu0 %v2188_v52  ;;  %v2226_v52 = vld [vmem:[#allocation8 + $0x124] ss:$28 sps:$4 sm:$0xff]  }
  0x72   :  { %1425 = vmatpush2.bf16.msra.mxu0 %v2193_v55  ;;  %v2227_v55 = vld [vmem:[#allocation8 + $0x430] ss:$28 sps:$4 sm:$0xff]  }
  0x73   :  { %1426 = vmatprep.subr.bf16.mxu0 %v2194_v56  ;;  %v2232_v56 = vld [vmem:[#allocation8 + $0xec] ss:$28 sps:$4 sm:$0xff]  }
  0x76   :  { %1427 = vmatpush2.bf16.msra.mxu0 %v2199_v59  ;;  %v2233_v59 = vld [vmem:[#allocation8 + $0x3f8] ss:$28 sps:$4 sm:$0xff]  }
  0x77   :  { %1525 = vmatprep.subr.bf16.mxu0 %v2205_v61  ;;  %v2241_v61 = vld [vmem:[#allocation8 + $0x3c4] ss:$28 sps:$4 sm:$0xff]  }
 0x100   :  { %v191_v8 = vpop.f32.mrf.mxu1 }
 0x101   :  { %v192_v16 = vadd.f32 %v191_v8, %v88_v10  ;;  %v2250_v8 = vld [vmem:[#allocation8 + $0x44] ss:$28 sps:$4 sm:$0xff]  }
 0x102   :  { %v193_v11 = vpop.f32.mrf.mxu1 }
 0x103   :  { %v194_v13 = vadd.f32 %v193_v11, %v92_v9  ;;  %v243_v25 = vmax.f32 %v192_v16, 0.0  ;;  %v2251_v11 = vld [vmem:[#allocation8 + $0x548] ss:$28 sps:$4 sm:$0xff]   ;;  %v2257_v16 = vld [vmem:[#allocation8 + $0x198] ss:$28 sps:$4 sm:$0xff]  }
 0x104   :  { %v195_v12 = vpop.f32.mrf.mxu1 }
 0x105   :  { %v196_v14 = vadd.f32 %v195_v12, %v88_v10  ;;  %v244_v22 = vmax.f32 %v194_v13, 0.0  ;;  %v2248_v10 = vld [vmem:[#allocation8 + $0x40] ss:$28 sps:$4 sm:$0xff]   ;;  %v2256_v12 = vld [vmem:[#allocation8 + $0xc] ss:$28 sps:$4 sm:$0xff]  }
 0x106   :  { %v197_v17 = vpop.f32.mrf.mxu1  ;;  %v2259_v13 = vld [vmem:[#allocation8 + $0x19c] ss:$28 sps:$4 sm:$0xff]  }
 0x107   :  { %v198_v19 = vadd.f32 %v197_v17, %v92_v9  ;;  %v247_v20 = vmax.f32 %v196_v14, 0.0  ;;  %v2253_v9 = vld [vmem:[#allocation8 + $0x54c] ss:$28 sps:$4 sm:$0xff]   ;;  %v2262_v17 = vld [vmem:[#allocation8 + $0x354] ss:$28 sps:$4 sm:$0xff]  }
 0x108   :  { %v234_v21 = vpop.f32.mrf.mxu1  ;;  %v2254_v14 = vld [vmem:[#allocation8 + $0x8] ss:$28 sps:$4 sm:$0xff]  }
 0x109   :  { %v248_v23 = vmax.f32 %v198_v19, 0.0  ;;  %v2626_v30 = vpack.c.bf16 %v247_v20, %v243_v25  ;;  %v235_v35 = vadd.f32 %v234_v21, %v96_v26  ;;  %v2265_v19 = vld [vmem:[#allocation8 + $0x164] ss:$28 sps:$4 sm:$0xff]   ;;  %v2260_v20 = vld [vmem:[#allocation8 + $0x350] ss:$28 sps:$4 sm:$0xff]  }
 0x10a   :  { %v236_v27 = vpop.f32.mrf.mxu1  ;;  %v2263_v21 = vld [vmem:[#allocation8 + $0x160] ss:$28 sps:$4 sm:$0xff]   ;;  %v2269_v25 = vld [vmem:[#allocation8 + $0x128] ss:$28 sps:$4 sm:$0xff]  }
 0x10b   :  { %v2624_v28 = vpack.c.bf16 %v248_v23, %v244_v22  ;;  %v237_v33 = vadd.f32 %v236_v27, %v100_v24  ;;  %v245_v43 = vmax.f32 %v235_v35, 0.0  ;;  %v2268_v22 = vld [vmem:[#allocation8 + $0x31c] ss:$28 sps:$4 sm:$0xff]   ;;  %v2271_v23 = vld [vmem:[#allocation8 + $0x12c] ss:$28 sps:$4 sm:$0xff]  }
 0x10c   :  { %v238_v31 = vpop.f32.mrf.mxu1  ;;  %v2277_v27 = vld [vmem:[#allocation8 + $0xf4] ss:$28 sps:$4 sm:$0xff]  }
 0x10d   :  { %v239_v34 = vadd.f32 %v238_v31, %v96_v26  ;;  %1428 = vmatprep.mubr.bf16.mxu0 %v2624_v28  ;;  %v246_v41 = vmax.f32 %v237_v33, 0.0  ;;  %v2274_v26 = vld [vmem:[#allocation8 + $0x2e4] ss:$28 sps:$4 sm:$0xff]   ;;  %v2275_v31 = vld [vmem:[#allocation8 + $0xf0] ss:$28 sps:$4 sm:$0xff]  }
 0x10e   :  { %v240_v36 = vpop.f32.mrf.mxu1  ;;  %1429 = vmatmul.mubr.bf16.vlgmr.msra.gmra.mxu0 %v2626_v30  ;;  %v2283_v33 = vld [vmem:[#allocation8 + $0xbc] ss:$28 sps:$4 sm:$0xff]  }
 0x10f   :  { %v241_v37 = vadd.f32 %v240_v36, %v100_v24  ;;  %1526 = vmatpush1.bf16.msra.mxu0 %v2203_v29  ;;  %v249_v39 = vmax.f32 %v239_v34, 0.0  ;;  %v2266_v24 = vld [vmem:[#allocation8 + $0x318] ss:$28 sps:$4 sm:$0xff]   ;;  %v2272_v29 = vld [vmem:[#allocation8 + $0x2e0] ss:$28 sps:$4 sm:$0xff]  }
 0x110   :  { %1527 = vmatprep.subr.bf16.mxu0 %v2211_v32  ;;  %v2280_v32 = vld [vmem:[#allocation8 + $0x2ac] ss:$28 sps:$4 sm:$0xff]   ;;  %v2281_v35 = vld [vmem:[#allocation8 + $0xb8] ss:$28 sps:$4 sm:$0xff]  }
 0x111   :  { %v250_v42 = vmax.f32 %v241_v37, 0.0  ;;  %v2632_v47 = vpack.c.bf16 %v249_v39, %v245_v43  ;;  %v2278_v34 = vld [vmem:[#allocation8 + $0x2a8] ss:$28 sps:$4 sm:$0xff]   ;;  %v2286_v36 = vld [vmem:[#allocation8 + $0x274] ss:$28 sps:$4 sm:$0xff]  }
 0x112   :  { %v2289_v37 = vld [vmem:[#allocation8 + $0x84] ss:$28 sps:$4 sm:$0xff]  }
 0x113   :  { %v2630_v44 = vpack.c.bf16 %v250_v42, %v246_v41  ;;  %1528 = vmatpush1.bf16.msra.mxu0 %v2209_v38  ;;  %v2284_v38 = vld [vmem:[#allocation8 + $0x270] ss:$28 sps:$4 sm:$0xff]   ;;  %v2287_v39 = vld [vmem:[#allocation8 + $0x80] ss:$28 sps:$4 sm:$0xff]   ;;  %v2290_v42 = vld [vmem:[#allocation8 + $0x238] ss:$28 sps:$4 sm:$0xff]  }
 0x114   :  { %1529 = vmatprep.subr.bf16.mxu0 %v2217_v40  ;;  %v2292_v40 = vld [vmem:[#allocation8 + $0x23c] ss:$28 sps:$4 sm:$0xff]   ;;  %v2295_v41 = vld [vmem:[#allocation8 + $0x4c] ss:$28 sps:$4 sm:$0xff]  }
 0x115   :  { %2066 = vmatprep.mubr.msk.bf16.mxu1 %vm1392_vm2, %v2630_v44  ;;  %2067 = vmatprep.mubr.msk.bf16.mxu0 %vm1392_vm2, %v2630_v44  ;;  %v2293_v43 = vld [vmem:[#allocation8 + $0x48] ss:$28 sps:$4 sm:$0xff]  }
 0x116   :  { %1472 = vmatmul.mubr.bf16.vlgmr.msra.gmra.mxu1 %v2632_v47 }
 0x117   :  { %1483 = vmatpush1.bf16.msra.mxu1 %v2212_v45  ;;  %1530 = vmatpush1.bf16.msra.mxu0 %v2215_v46  ;;  %v2298_v45 = vld [vmem:[#allocation8 + $0x204] ss:$28 sps:$4 sm:$0xff]   ;;  %v2301_v46 = vld [vmem:[#allocation8 + $0x14] ss:$28 sps:$4 sm:$0xff]  }
 0x118   :  { %1514 = vmatprep.mubr.bf16.mxu1 %v2624_v28  ;;  %1484 = vmatprep.subr.bf16.mxu1 %v2220_v48  ;;  %v2296_v48 = vld [vmem:[#allocation8 + $0x200] ss:$28 sps:$4 sm:$0xff]  }
 0x119   :  { %1531 = vmatprep.subr.bf16.mxu0 %v2223_v49  ;;  %v2299_v49 = vld [vmem:[#allocation8 + $0x10] ss:$28 sps:$4 sm:$0xff]  }
 0x11b   :  { %1485 = vmatpush1.bf16.msra.mxu1 %v2218_v50  ;;  %1532 = vmatpush1.bf16.msra.mxu0 %v2221_v51  ;;  %v2304_v50 = vld [vmem:[#allocation8 + $0x1cc] ss:$28 sps:$4 sm:$0xff]   ;;  %v2307_v51 = vld [vmem:[#allocation8 + $0x35c] ss:$28 sps:$4 sm:$0xff]  }
 0x11c   :  { %1486 = vmatprep.subr.bf16.mxu1 %v2226_v52  ;;  %1533 = vmatprep.subr.bf16.mxu0 %v2229_v53  ;;  %v2302_v52 = vld [vmem:[#allocation8 + $0x1c8] ss:$28 sps:$4 sm:$0xff]   ;;  %v2305_v53 = vld [vmem:[#allocation8 + $0x358] ss:$28 sps:$4 sm:$0xff]  }
 0x11f   :  { %1487 = vmatpush1.bf16.msra.mxu1 %v2224_v54  ;;  %1534 = vmatpush1.bf16.msra.mxu0 %v2227_v55  ;;  %v2310_v54 = vld [vmem:[#allocation8 + $0x324] ss:$28 sps:$4 sm:$0xff]   ;;  %v2313_v55 = vld [vmem:[#allocation8 + $0x51c] ss:$28 sps:$4 sm:$0xff]  }
 0x120   :  { %1488 = vmatprep.subr.bf16.mxu1 %v2232_v56  ;;  %1535 = vmatprep.subr.bf16.mxu0 %v2235_v57  ;;  %v2308_v56 = vld [vmem:[#allocation8 + $0x320] ss:$28 sps:$4 sm:$0xff]   ;;  %v2311_v57 = vld [vmem:[#allocation8 + $0x518] ss:$28 sps:$4 sm:$0xff]  }
 0x123   :  { %1489 = vmatpush1.bf16.msra.mxu1 %v2230_v58  ;;  %1536 = vmatpush1.bf16.msra.mxu0 %v2233_v59  ;;  %v2316_v58 = vld [vmem:[#allocation8 + $0x2ec] ss:$28 sps:$4 sm:$0xff]   ;;  %v2319_v59 = vld [vmem:[#allocation8 + $0x4e4] ss:$28 sps:$4 sm:$0xff]  }
 0x124   :  { %1490 = vmatprep.subr.bf16.mxu1 %v2238_v60  ;;  %1537 = vmatprep.subr.bf16.mxu0 %v2241_v61  ;;  %v2314_v60 = vld [vmem:[#allocation8 + $0x2e8] ss:$28 sps:$4 sm:$0xff]   ;;  %v2317_v61 = vld [vmem:[#allocation8 + $0x4e0] ss:$28 sps:$4 sm:$0xff]  }
 0x127   :  { %1491 = vmatpush1.bf16.msra.mxu1 %v2236_v62  ;;  %1538 = vmatpush1.bf16.msra.mxu0 %v2239_v63  ;;  %v2322_v62 = vld [vmem:[#allocation8 + $0x2b4] ss:$28 sps:$4 sm:$0xff]   ;;  %v2325_v63 = vld [vmem:[#allocation8 + $0x4ac] ss:$28 sps:$4 sm:$0xff]  }
 0x128   :  { %1492 = vmatprep.subr.bf16.mxu1 %v2244_v1  ;;  %1539 = vmatprep.subr.bf16.mxu0 %v2247_v2  ;;  %v2320_v1 = vld [vmem:[#allocation8 + $0x2b0] ss:$28 sps:$4 sm:$0xff]   ;;  %v2323_v2 = vld [vmem:[#allocation8 + $0x4a8] ss:$28 sps:$4 sm:$0xff]  }
 0x12b   :  { %1493 = vmatpush1.bf16.msra.mxu1 %v2242_v3  ;;  %1540 = vmatpush1.bf16.msra.mxu0 %v2245_v7  ;;  %v2328_v3 = vld [vmem:[#allocation8 + $0x27c] ss:$28 sps:$4 sm:$0xff]   ;;  %v2331_v7 = vld [vmem:[#allocation8 + $0x474] ss:$28 sps:$4 sm:$0xff]  }
 0x12c   :  { %1494 = vmatprep.subr.bf16.mxu1 %v2250_v8  ;;  %1555 = vmatprep.subr.bf16.mxu0 %v2253_v9  ;;  %v2326_v8 = vld [vmem:[#allocation8 + $0x278] ss:$28 sps:$4 sm:$0xff]   ;;  %v2329_v9 = vld [vmem:[#allocation8 + $0x470] ss:$28 sps:$4 sm:$0xff]  }
 0x12f   :  { %1495 = vmatpush1.bf16.msra.mxu1 %v2248_v10  ;;  %1556 = vmatpush2.bf16.msra.mxu0 %v2251_v11  ;;  %v2334_v10 = vld [vmem:[#allocation8 + $0x244] ss:$28 sps:$4 sm:$0xff]   ;;  %v2337_v11 = vld [vmem:[#allocation8 + $0x43c] ss:$28 sps:$4 sm:$0xff]  }
 0x130   :  { %1496 = vmatprep.subr.bf16.mxu1 %v2256_v12  ;;  %1568 = vmatprep.subr.bf16.mxu0 %v2259_v13  ;;  %v2332_v12 = vld [vmem:[#allocation8 + $0x240] ss:$28 sps:$4 sm:$0xff]   ;;  %v2335_v13 = vld [vmem:[#allocation8 + $0x438] ss:$28 sps:$4 sm:$0xff]  }
 0x132   :  { %1558 = vmatmul.mubr.bf16.vlgmr.msra.gmra.mxu0 %v2632_v47 }
 0x133   :  { %1497 = vmatpush1.bf16.msra.mxu1 %v2254_v14  ;;  %1569 = vmatpush1.bf16.msra.mxu0 %v2257_v16  ;;  %v2340_v14 = vld [vmem:[#allocation8 + $0x20c] ss:$28 sps:$4 sm:$0xff]   ;;  %v2343_v16 = vld [vmem:[#allocation8 + $0x404] ss:$28 sps:$4 sm:$0xff]  }
 0x134   :  { %1600 = vmatprep.mubr.bf16.mxu0 %v2624_v28  ;;  %1498 = vmatprep.subr.bf16.mxu1 %v2262_v17  ;;  %v2338_v17 = vld [vmem:[#allocation8 + $0x208] ss:$28 sps:$4 sm:$0xff]  }
 0x135   :  { %1570 = vmatprep.subr.bf16.mxu0 %v2265_v19  ;;  %v2341_v19 = vld [vmem:[#allocation8 + $0x400] ss:$28 sps:$4 sm:$0xff]  }
 0x137   :  { %1499 = vmatpush2.bf16.msra.mxu1 %v2260_v20  ;;  %1571 = vmatpush1.bf16.msra.mxu0 %v2263_v21  ;;  %v2346_v20 = vld [vmem:[#allocation8 + $0x1d4] ss:$28 sps:$4 sm:$0xff]   ;;  %v2349_v21 = vld [vmem:[#allocation8 + $0x3cc] ss:$28 sps:$4 sm:$0xff]  }
 0x138   :  { %1500 = vmatprep.subr.bf16.mxu1 %v2268_v22  ;;  %1572 = vmatprep.subr.bf16.mxu0 %v2271_v23  ;;  %v2344_v22 = vld [vmem:[#allocation8 + $0x1d0] ss:$28 sps:$4 sm:$0xff]   ;;  %v2347_v23 = vld [vmem:[#allocation8 + $0x3c8] ss:$28 sps:$4 sm:$0xff]  }
 0x13b   :  { %1501 = vmatpush2.bf16.msra.mxu1 %v2266_v24  ;;  %1573 = vmatpush1.bf16.msra.mxu0 %v2269_v25  ;;  %v2352_v24 = vld [vmem:[#allocation8 + $0x394] ss:$28 sps:$4 sm:$0xff]  }
 0x13c   :  { %1502 = vmatprep.subr.bf16.mxu1 %v2274_v26  ;;  %1574 = vmatprep.subr.bf16.mxu0 %v2277_v27  ;;  %v2350_v25 = vld [vmem:[#allocation8 + $0x390] ss:$28 sps:$4 sm:$0xff]   ;;  %v2353_v26 = vld [vmem:[#allocation8 + $0x520] ss:$28 sps:$4 sm:$0xff]  }
 0x13d   :  { %v2356_v27 = vld [vmem:[#allocation8 + $0x554] ss:$28 sps:$4 sm:$0xff]  }
 0x13f   :  { %1503 = vmatpush2.bf16.msra.mxu1 %v2272_v29  ;;  %1575 = vmatpush1.bf16.msra.mxu0 %v2275_v31  ;;  %v2354_v29 = vld [vmem:[#allocation8 + $0x550] ss:$28 sps:$4 sm:$0xff]   ;;  %v2357_v31 = vld [vmem:[#allocation8 + $0x4e8] ss:$28 sps:$4 sm:$0xff]  }
 0x140   :  { %1504 = vmatprep.subr.bf16.mxu1 %v2280_v32  ;;  %1576 = vmatprep.subr.bf16.mxu0 %v2283_v33  ;;  %v2358_v32 = vld [vmem:[#allocation8 + $0x360] ss:$28 sps:$4 sm:$0xff]  }
 0x141   :  { %v2359_v33 = vld [vmem:[#allocation8 + $0x1a0] ss:$28 sps:$4 sm:$0xff]  }
 0x143   :  { %1505 = vmatpush2.bf16.msra.mxu1 %v2278_v34  ;;  %1577 = vmatpush1.bf16.msra.mxu0 %v2281_v35  ;;  %v2360_v34 = vld [vmem:[#allocation8 + $0x4b0] ss:$28 sps:$4 sm:$0xff]   ;;  %v2361_v35 = vld [vmem:[#allocation8 + $0x328] ss:$28 sps:$4 sm:$0xff]  }
 0x144   :  { %1506 = vmatprep.subr.bf16.mxu1 %v2286_v36  ;;  %1578 = vmatprep.subr.bf16.mxu0 %v2289_v37  ;;  %v2362_v36 = vld [vmem:[#allocation8 + $0x168] ss:$28 sps:$4 sm:$0xff]   ;;  %v2364_v37 = vld [vmem:[#allocation8 + $0x2f0] ss:$28 sps:$4 sm:$0xff]  }
 0x147   :  { %1507 = vmatpush2.bf16.msra.mxu1 %v2284_v38  ;;  %1579 = vmatpush1.bf16.msra.mxu0 %v2287_v39  ;;  %v2365_v38 = vld [vmem:[#allocation8 + $0x130] ss:$28 sps:$4 sm:$0xff]   ;;  %v2366_v39 = vld [vmem:[#allocation8 + $0x440] ss:$28 sps:$4 sm:$0xff]  }
 0x148   :  { %1508 = vmatprep.subr.bf16.mxu1 %v2292_v40  ;;  %1580 = vmatprep.subr.bf16.mxu0 %v2295_v41  ;;  %v2367_v40 = vld [vmem:[#allocation8 + $0x2b8] ss:$28 sps:$4 sm:$0xff]  }
 0x149   :  { %v2368_v41 = vld [vmem:[#allocation8 + $0xf8] ss:$28 sps:$4 sm:$0xff]  }
 0x14b   :  { %1509 = vmatpush2.bf16.msra.mxu1 %v2290_v42  ;;  %1581 = vmatpush1.bf16.msra.mxu0 %v2293_v43  ;;  %v2370_v42 = vld [vmem:[#allocation8 + $0x280] ss:$28 sps:$4 sm:$0xff]  }
 0x14c   :  { %1510 = vmatprep.subr.bf16.mxu1 %v2298_v45  ;;  %1582 = vmatprep.subr.bf16.mxu0 %v2301_v46  ;;  %v2371_v43 = vld [vmem:[#allocation8 + $0xc0] ss:$28 sps:$4 sm:$0xff]   ;;  %v2372_v45 = vld [vmem:[#allocation8 + $0x3d0] ss:$28 sps:$4 sm:$0xff]   ;;  %v2373_v46 = vld [vmem:[#allocation8 + $0x248] ss:$28 sps:$4 sm:$0xff]  }
 0x14f   :  { %1511 = vmatpush2.bf16.msra.mxu1 %v2296_v48  ;;  %1583 = vmatpush1.bf16.msra.mxu0 %v2299_v49  ;;  %v2374_v48 = vld [vmem:[#allocation8 + $0x88] ss:$28 sps:$4 sm:$0xff]   ;;  %v2375_v49 = vld [vmem:[#allocation8 + $0x398] ss:$28 sps:$4 sm:$0xff]  }
 0x150   :  { %1512 = vmatprep.subr.bf16.mxu1 %v2304_v50  ;;  %1584 = vmatprep.subr.bf16.mxu0 %v2307_v51  ;;  %v2376_v50 = vld [vmem:[#allocation8 + $0x210] ss:$28 sps:$4 sm:$0xff]  }
 0x151   :  { %v2377_v51 = vld [vmem:[#allocation8 + $0x50] ss:$28 sps:$4 sm:$0xff]  }
 0x153   :  { %1513 = vmatpush2.bf16.msra.mxu1 %v2302_v52  ;;  %1585 = vmatpush2.bf16.msra.mxu0 %v2305_v53  ;;  %v2378_v52 = vld [vmem:[#allocation8 + $0x558] ss:$28 sps:$4 sm:$0xff]  }
 0x154   :  { %1586 = vmatprep.subr.bf16.mxu0 %v2310_v54  ;;  %1611 = vmatprep.subr.bf16.mxu1 %v2313_v55  ;;  %v2379_v53 = vld [vmem:[#allocation8 + $0x1d8] ss:$28 sps:$4 sm:$0xff]   ;;  %v2664_v55 = vld [vmem:[%s2694_s4] sm:$0x7f]  ;;  %s2556_s4 = smov [#allocation10]  }
 0x155   :  { %v2380_v54 = vld [vmem:[#allocation8 + $0x18] ss:$28 sps:$4 sm:$0xff]   ;;  %s1864_s17 = sshll.u32 %s2556_s4, 4  ;;  %s1865_s17 = int_to_ptr.vmem [resolvable:$true] %s1864_s17 }
 0x156   :  { %1515 = vmatmul.mubr.bf16.vlgmr.msra.gmra.mxu1 %v2626_v30  ;;  %s2517_s18 = scalar_lea.vmem %s1865_s17, 896  ;;  %p2522_p7 = scmp.lt.s32.totalorder %s1865_s17, %s1865_s17 }
 0x157   :  { %1587 = vmatpush2.bf16.msra.mxu0 %v2308_v56  ;;  %1612 = vmatpush1.bf16.msra.mxu1 %v2311_v57  ;;  %p2518_p6 = scmp.ne.s32.totalorder %s1865_s17, %s2517_s18  ;;  %p2523_p8 = scmp.lt.s32.totalorder %s2517_s18, %s2517_s18 }
 0x158   :  { %2068 = vmatprep.mubr.msk.bf16.mxu1 %vm1392_vm2, %v2630_v44  ;;  %1588 = vmatprep.subr.bf16.mxu0 %v2316_v58  ;;  %v464_v58 = vrot.slane %v2664_v55, %v91_v5 }
 0x159   :  { %1613 = vmatprep.subr.bf16.mxu1 %v2319_v59  ;;  %p2524_p9 = por %p2523_p8, %p2522_p7 }
 0x15b   :  { %1589 = vmatpush2.bf16.msra.mxu0 %v2314_v60  ;;  %1614 = vmatpush1.bf16.msra.mxu1 %v2317_v61  ;;  %p2525_p10 = pnand %p2524_p9, %p2518_p6 }
 0x15c   :  { %1590 = vmatprep.subr.bf16.mxu0 %v2322_v62  ;;  %1615 = vmatprep.subr.bf16.mxu1 %v2325_v63 }
 0x15f   :  { %1591 = vmatpush2.bf16.msra.mxu0 %v2320_v1  ;;  %1616 = vmatpush1.bf16.msra.mxu1 %v2323_v2 }
 0x160   :  { %1592 = vmatprep.subr.bf16.mxu0 %v2328_v3  ;;  %1617 = vmatprep.subr.bf16.mxu1 %v2331_v7 }
 0x163   :  { %1593 = vmatpush2.bf16.msra.mxu0 %v2326_v8  ;;  %1618 = vmatpush1.bf16.msra.mxu1 %v2329_v9 }
 0x164   :  { %1594 = vmatprep.subr.bf16.mxu0 %v2334_v10  ;;  %1619 = vmatprep.subr.bf16.mxu1 %v2337_v11 }
 0x167   :  { %1595 = vmatpush2.bf16.msra.mxu0 %v2332_v12  ;;  %1620 = vmatpush1.bf16.msra.mxu1 %v2335_v13 }
 0x168   :  { %1596 = vmatprep.subr.bf16.mxu0 %v2340_v14  ;;  %1621 = vmatprep.subr.bf16.mxu1 %v2343_v16 }
 0x16b   :  { %1597 = vmatpush2.bf16.msra.mxu0 %v2338_v17  ;;  %1622 = vmatpush1.bf16.msra.mxu1 %v2341_v19 }
 0x16c   :  { %1598 = vmatprep.subr.bf16.mxu0 %v2346_v20  ;;  %1623 = vmatprep.subr.bf16.mxu1 %v2349_v21 }
 0x16f   :  { %1599 = vmatpush2.bf16.msra.mxu0 %v2344_v22  ;;  %1624 = vmatpush1.bf16.msra.mxu1 %v2347_v23 }
 0x170   :  { %1625 = vmatprep.subr.bf16.mxu1 %v2352_v24  ;;  %1695 = vmatprep.subr.bf16.mxu0 %v2555_v0 }
 0x172   :  { %1601 = vmatmul.mubr.bf16.vlgmr.msra.gmra.mxu0 %v2626_v30 }
 0x173   :  { %1626 = vmatpush1.bf16.msra.mxu1 %v2350_v25  ;;  %1696 = vmatpush1.bf16.msra.mxu0 %v2353_v26 }
 0x174   :  { %2069 = vmatprep.mubr.msk.bf16.mxu0 %vm1392_vm2, %v2630_v44  ;;  %1641 = vmatprep.subr.bf16.mxu1 %v2356_v27  ;;  %v2363_v44 = vld [vmem:[#allocation8 + $0x478] ss:$28 sps:$4 sm:$0xff]  }
 0x175   :  { %1697 = vmatprep.subr.bf16.mxu0 %v2555_v0 }
 0x177   :  { %1642 = vmatpush2.bf16.msra.mxu1 %v2354_v29  ;;  %1698 = vmatpush1.bf16.msra.mxu0 %v2357_v31 }
 0x178   :  { %2086 = vmatprep.subr.bf16.mxu1 %v2358_v32  ;;  %1699 = vmatprep.subr.bf16.mxu0 %v2555_v0 }
 0x17a   :  { %1644 = vmatmul.mubr.bf16.vlgmr.msra.gmra.mxu1 %v2632_v47 }
 0x17b   :  { %2087 = vmatpush3.bf16.msra.mxu1 %v2359_v33  ;;  %1686 = vmatprep.mubr.bf16.mxu1 %v2624_v28  ;;  %v2369_v28 = vld [vmem:[#allocation8 + $0x408] ss:$28 sps:$4 sm:$0xff]  }
 0x17c   :  { %1700 = vmatpush1.bf16.msra.mxu0 %v2360_v34  ;;  %2088 = vmatprep.subr.bf16.mxu1 %v2361_v35 }
 0x17d   :  { %1701 = vmatprep.subr.bf16.mxu0 %v2555_v0 }
 0x17f   :  { %2089 = vmatpush3.bf16.msra.mxu1 %v2362_v36  ;;  %v468_v36 = vrot.slane %v2664_v55, %v95_v18 }
 0x180   :  { %1702 = vmatpush1.bf16.msra.mxu0 %v2363_v44  ;;  %2090 = vmatprep.subr.bf16.mxu1 %v2364_v37  ;;  %v472_v44 = vrot.slane %v2664_v55, %v99_v15 }
 0x181   :  { %1703 = vmatprep.subr.bf16.mxu0 %v2555_v0 }
 0x183   :  { %2091 = vmatpush3.bf16.msra.mxu1 %v2365_v38 }
 0x184   :  { %1704 = vmatpush1.bf16.msra.mxu0 %v2366_v39  ;;  %2092 = vmatprep.subr.bf16.mxu1 %v2367_v40 }
 0x185   :  { %1705 = vmatprep.subr.bf16.mxu0 %v2555_v0 }
 0x187   :  { %2093 = vmatpush3.bf16.msra.mxu1 %v2368_v41 }
 0x188   :  { %1706 = vmatpush1.bf16.msra.mxu0 %v2369_v28  ;;  %2094 = vmatprep.subr.bf16.mxu1 %v2370_v42 }
 0x189   :  { %1707 = vmatprep.subr.bf16.mxu0 %v2555_v0 }
 0x18b   :  { %2095 = vmatpush3.bf16.msra.mxu1 %v2371_v43 }
 0x18c   :  { %1708 = vmatpush1.bf16.msra.mxu0 %v2372_v45  ;;  %2096 = vmatprep.subr.bf16.mxu1 %v2373_v46 }
 0x18d   :  { %1709 = vmatprep.subr.bf16.mxu0 %v2555_v0 }
 0x18f   :  { %2097 = vmatpush3.bf16.msra.mxu1 %v2374_v48 }
 0x190   :  { %1710 = vmatpush1.bf16.msra.mxu0 %v2375_v49  ;;  %2098 = vmatprep.subr.bf16.mxu1 %v2376_v50 }
 0x191   :  { %1725 = vmatprep.subr.bf16.mxu0 %v2555_v0  ;;  %v460_v0 = vrot.slane %v2664_v55, %v87_v6 }
 0x193   :  { %2099 = vmatpush3.bf16.msra.mxu1 %v2377_v51 }
 0x194   :  { %1726 = vmatpush2.bf16.msra.mxu0 %v2378_v52  ;;  %2100 = vmatprep.subr.bf16.mxu1 %v2379_v53 }
 0x197   :  { %1728 = vmatmul.mubr.bf16.vlgmr.msra.gmra.mxu0 %v2632_v47  ;;  %2101 = vmatpush3.bf16.msra.mxu1 %v2380_v54 }
 0x19a   :  { %1687 = vmatmul.mubr.bf16.vlgmr.msra.gmra.mxu1 %v2626_v30 }
 0x1ce   :  { %v1430_v56 = vpop.f32.mrf.mxu0 }
 0x1cf   :  { %v1431_v47 = vadd.f32 %v1430_v56, %v460_v0 }
 0x1d0   :  { %v1432_v57 = vpop.f32.mrf.mxu0 }
 0x1d1   :  { %v1433_v61 = vadd.f32 %v1432_v57, %v464_v58 }
 0x1d2   :  { %v1434_v59 = vpop.f32.mrf.mxu0 }
 0x1d3   :  { %v1435_v1 = vadd.f32 %v1434_v59, %v460_v0 }
 0x1d4   :  { %v1436_v62 = vpop.f32.mrf.mxu0 }
 0x1d5   :  { %v1437_v8 = vadd.f32 %v1436_v62, %v464_v58 }
 0x1d6   :  { %v1473_v60 = vpop.f32.mrf.mxu1 }
 0x1d7   :  { %v1474_v30 = vadd.f32 %v1473_v60, %v1431_v47 }
 0x1d8   :  { %v1475_v63 = vpop.f32.mrf.mxu1 }
 0x1d9   :  { %v1736_v2 = vsub.f32 0.0, %v1474_v30  ;;  %v1476_v3 = vadd.f32 %v1475_v63, %v1433_v61  ;;  %v475_v63 = vsub.s32 4, %v2610_v4 }
 0x1da   :  { %v1477_v7 = vpop.f32.mrf.mxu1 }
 0x1db   :  { %v1750_v9 = vmul.f32 1.442695, %v1736_v2  ;;  %v1737_v10 = vsub.f32 0.0, %v1476_v3  ;;  %v1478_v11 = vadd.f32 %v1477_v7, %v1435_v1  ;;  %v479_v7 = vsub.s32 5, %v2610_v4 }
 0x1dc   :  { %v1479_v6 = vpop.f32.mrf.mxu1 }
 0x1dd   :  { %2381 = vpow2.f32 %v1750_v9  ;;  %v1752_v12 = vmul.f32 1.442695, %v1737_v10  ;;  %v1743_v13 = vsub.f32 0.0, %v1478_v11  ;;  %v1480_v5 = vadd.f32 %v1479_v6, %v1437_v8 }
 0x1de   :  { %v476_v9 = vrot.slane %v2664_v55, %v475_v63  ;;  %v480_v10 = vrot.slane %v2664_v55, %v479_v7 }
 0x1df   :  { %2383 = vpow2.f32 %v1752_v12  ;;  %v1764_v14 = vmul.f32 1.442695, %v1743_v13  ;;  %v1744_v16 = vsub.f32 0.0, %v1480_v5 }
 0x1e1   :  { %2385 = vpow2.f32 %v1764_v14  ;;  %v1766_v17 = vmul.f32 1.442695, %v1744_v16 }
 0x1e3   :  { %2387 = vpow2.f32 %v1766_v17 }
 0x1ea   :  { %v2382_v19 = vpop.eup %2381 }
 0x1eb   :  { %v1778_v20 = vadd.f32 1.0, %v2382_v19 }
 0x1ec   :  { %v2384_v21 = vpop.eup %2383 }
 0x1ed   :  { %v1779_v22 = vadd.f32 1.0, %v2384_v21  ;;  %2389 = vrcp.f32 %v1778_v20 }
 0x1ee   :  { %v2386_v23 = vpop.eup %2385 }
 0x1ef   :  { %2391 = vrcp.f32 %v1779_v22  ;;  %v1785_v24 = vadd.f32 1.0, %v2386_v23 }
 0x1f0   :  { %v2388_v25 = vpop.eup %2387 }
 0x1f1   :  { %v1786_v26 = vadd.f32 1.0, %v2388_v25  ;;  %2393 = vrcp.f32 %v1785_v24 }
 0x1f2   :  { %v1559_v35 = vpop.f32.mrf.mxu0 }
 0x1f3   :  { %2395 = vrcp.f32 %v1786_v26 }
 0x1f4   :  { %v1561_v37 = vpop.f32.mrf.mxu0 }
 0x1f6   :  { %v1563_v42 = vpop.f32.mrf.mxu0 }
 0x1f8   :  { %v1565_v53 = vpop.f32.mrf.mxu0 }
 0x1fa   :  { %v2390_v27 = vpop.eup %2389 }
 0x1fc   :  { %v2392_v29 = vpop.eup %2391 }
 0x1fd   :  { %v2078_v31 = vpack.c.bf16 %v2392_v29, %v2390_v27 }
 0x1fe   :  { %v2394_v32 = vpop.eup %2393 }
 0x1ff   :  { %1850 = vst [vmem:[#allocation10] sm:$0xff] %v2078_v31 }
 0x200   :  { %v2396_v33 = vpop.eup %2395 }
 0x201   :  { %v2082_v34 = vpack.c.bf16 %v2396_v33, %v2394_v32 }
 0x203   :  { %1855 = vst [vmem:[#allocation10 + $0x1c] sm:$0xff] %v2082_v34 }
 0x216   :  { %v1516_v38 = vpop.f32.mrf.mxu1 }
 0x217   :  { %v1517_v39 = vadd.f32 %v1516_v38, %v468_v36 }
 0x218   :  { %v1518_v40 = vpop.f32.mrf.mxu1 }
 0x219   :  { %v1560_v41 = vadd.f32 %v1559_v35, %v1517_v39  ;;  %v1519_v28 = vadd.f32 %v1518_v40, %v472_v44 }
 0x21a   :  { %v1520_v43 = vpop.f32.mrf.mxu1 }
 0x21b   :  { %v1738_v45 = vsub.f32 0.0, %v1560_v41  ;;  %v1562_v46 = vadd.f32 %v1561_v37, %v1519_v28  ;;  %v1521_v48 = vadd.f32 %v1520_v43, %v468_v36 }
 0x21c   :  { %v1522_v49 = vpop.f32.mrf.mxu1 }
 0x21d   :  { %v1754_v50 = vmul.f32 1.442695, %v1738_v45  ;;  %v1739_v51 = vsub.f32 0.0, %v1562_v46  ;;  %v1564_v52 = vadd.f32 %v1563_v42, %v1521_v48  ;;  %v1523_v18 = vadd.f32 %v1522_v49, %v472_v44 }
 0x21f   :  { %2397 = vpow2.f32 %v1754_v50  ;;  %v1756_v54 = vmul.f32 1.442695, %v1739_v51  ;;  %v1745_v15 = vsub.f32 0.0, %v1564_v52  ;;  %v1566_v56 = vadd.f32 %v1565_v53, %v1523_v18 }
 0x220   :  { %v483_v50 = vsub.s32 6, %v2610_v4 }
 0x221   :  { %2399 = vpow2.f32 %v1756_v54  ;;  %v1768_v57 = vmul.f32 1.442695, %v1745_v15  ;;  %v1746_v0 = vsub.f32 0.0, %v1566_v56 }
 0x222   :  { %v484_v53 = vrot.slane %v2664_v55, %v483_v50 }
 0x223   :  { %2401 = vpow2.f32 %v1768_v57  ;;  %v1770_v58 = vmul.f32 1.442695, %v1746_v0 }
 0x225   :  { %2403 = vpow2.f32 %v1770_v58 }
 0x22c   :  { %v2398_v59 = vpop.eup %2397 }
 0x22d   :  { %v1780_v47 = vadd.f32 1.0, %v2398_v59 }
 0x22e   :  { %v2400_v60 = vpop.eup %2399 }
 0x22f   :  { %v1781_v61 = vadd.f32 1.0, %v2400_v60  ;;  %2405 = vrcp.f32 %v1780_v47 }
 0x230   :  { %v2402_v30 = vpop.eup %2401 }
 0x231   :  { %2407 = vrcp.f32 %v1781_v61  ;;  %v1787_v62 = vadd.f32 1.0, %v2402_v30 }
 0x232   :  { %v2404_v1 = vpop.eup %2403  ;;  %v1602_v2 = vpop.f32.mrf.mxu0 }
 0x233   :  { %v1788_v3 = vadd.f32 1.0, %v2404_v1  ;;  %2409 = vrcp.f32 %v1787_v62  ;;  %v1603_v6 = vadd.f32 %v1602_v2, %v476_v9 }
 0x234   :  { %v1604_v8 = vpop.f32.mrf.mxu0 }
 0x235   :  { %2411 = vrcp.f32 %v1788_v3  ;;  %v1605_v13 = vadd.f32 %v1604_v8, %v480_v10 }
 0x236   :  { %v1606_v11 = vpop.f32.mrf.mxu0 }
 0x237   :  { %v1607_v19 = vadd.f32 %v1606_v11, %v476_v9 }
 0x238   :  { %v1608_v5 = vpop.f32.mrf.mxu0 }
 0x239   :  { %v1609_v23 = vadd.f32 %v1608_v5, %v480_v10 }
 0x23a   :  { %v1645_v12 = vpop.f32.mrf.mxu1 }
 0x23b   :  { %v1646_v14 = vadd.f32 %v1645_v12, %v1603_v6 }
 0x23c   :  { %v1647_v16 = vpop.f32.mrf.mxu1  ;;  %v2406_v17 = vpop.eup %2405 }
 0x23d   :  { %v1740_v20 = vsub.f32 0.0, %v1646_v14  ;;  %v1648_v21 = vadd.f32 %v1647_v16, %v1605_v13 }
 0x23e   :  { %v2408_v22 = vpop.eup %2407  ;;  %v1649_v24 = vpop.f32.mrf.mxu1 }
 0x23f   :  { %v2079_v25 = vpack.c.bf16 %v2408_v22, %v2406_v17  ;;  %v1758_v26 = vmul.f32 1.442695, %v1740_v20  ;;  %v1741_v27 = vsub.f32 0.0, %v1648_v21  ;;  %v1650_v29 = vadd.f32 %v1649_v24, %v1607_v19 }
 0x240   :  { %v1651_v31 = vpop.f32.mrf.mxu1  ;;  %v2410_v32 = vpop.eup %2409 }
 0x241   :  { %1851 = vst [vmem:[#allocation10 + $0x8] sm:$0xff] %v2079_v25  ;;  %2413 = vpow2.f32 %v1758_v26  ;;  %v1760_v33 = vmul.f32 1.442695, %v1741_v27  ;;  %v1747_v34 = vsub.f32 0.0, %v1650_v29  ;;  %v1652_v35 = vadd.f32 %v1651_v31, %v1609_v23 }
 0x242   :  { %v2412_v36 = vpop.eup %2411 }
 0x243   :  { %v2083_v44 = vpack.c.bf16 %v2412_v36, %v2410_v32  ;;  %2415 = vpow2.f32 %v1760_v33  ;;  %v1772_v37 = vmul.f32 1.442695, %v1747_v34  ;;  %v1748_v38 = vsub.f32 0.0, %v1652_v35 }
 0x245   :  { %1856 = vst [vmem:[#allocation10 + $0x24] sm:$0xff] %v2083_v44  ;;  %2417 = vpow2.f32 %v1772_v37  ;;  %v1774_v39 = vmul.f32 1.442695, %v1748_v38 }
 0x247   :  { %2419 = vpow2.f32 %v1774_v39 }
 0x24e   :  { %v2414_v40 = vpop.eup %2413 }
 0x24f   :  { %v1782_v41 = vadd.f32 1.0, %v2414_v40 }
 0x250   :  { %v2416_v28 = vpop.eup %2415 }
 0x251   :  { %v1783_v42 = vadd.f32 1.0, %v2416_v28  ;;  %2421 = vrcp.f32 %v1782_v41 }
 0x252   :  { %v2418_v43 = vpop.eup %2417 }
 0x253   :  { %2423 = vrcp.f32 %v1783_v42  ;;  %v1789_v45 = vadd.f32 1.0, %v2418_v43 }
 0x254   :  { %v2420_v46 = vpop.eup %2419 }
 0x255   :  { %v1790_v48 = vadd.f32 1.0, %v2420_v46  ;;  %2425 = vrcp.f32 %v1789_v45 }
 0x257   :  { %2427 = vrcp.f32 %v1790_v48  ;;  %v1729_v49 = vpop.f32.mrf.mxu0 }
 0x259   :  { %v1731_v51 = vpop.f32.mrf.mxu0 }
 0x25a   :  { %v2102_v52 = vpop.f32.mrf.mxu1 }
 0x25b   :  { %v1732_v18 = vpop.f32.mrf.mxu0 }
 0x25c   :  { %v2103_v54 = vpop.f32.mrf.mxu1 }
 0x25d   :  { %v2104_v15 = vadd.f32 %v2103_v54, %v2102_v52  ;;  %v1734_v56 = vpop.f32.mrf.mxu0 }
 0x25e   :  { %v2105_v57 = vpop.f32.mrf.mxu1  ;;  %v2422_v0 = vpop.eup %2421 }
 0x25f   :  { %v1689_v58 = vadd.f32 %v2104_v15, %v484_v53 }
 0x260   :  { %v2424_v59 = vpop.eup %2423  ;;  %v2106_v47 = vpop.f32.mrf.mxu1 }
 0x261   :  { %v2080_v60 = vpack.c.bf16 %v2424_v59, %v2422_v0  ;;  %v1730_v61 = vadd.f32 %v1729_v49, %v1689_v58  ;;  %v2107_v30 = vadd.f32 %v2106_v47, %v2105_v57 }
 0x262   :  { %v2426_v62 = vpop.eup %2425 }
 0x263   :  { %1852 = vst [vmem:[#allocation10 + $0x10] sm:$0xff] %v2080_v60  ;;  %v1742_v63 = vsub.f32 0.0, %v1730_v61  ;;  %v1692_v4 = vadd.f32 %v2107_v30, %v484_v53 }
 0x264   :  { %v2428_v1 = vpop.eup %2427 }
 0x265   :  { %v2084_v2 = vpack.c.bf16 %v2428_v1, %v2426_v62  ;;  %v1762_v3 = vmul.f32 1.442695, %v1742_v63  ;;  %v1733_v7 = vadd.f32 %v1732_v18, %v1692_v4 }
 0x267   :  { %1857 = vst [vmem:[#allocation10 + $0x2c] sm:$0xff] %v2084_v2  ;;  %2429 = vpow2.f32 %v1762_v3  ;;  %v1749_v55 = vsub.f32 0.0, %v1733_v7 }
 0x269   :  { %v1776_v8 = vmul.f32 1.442695, %v1749_v55 }
 0x26b   :  { %2431 = vpow2.f32 %v1776_v8 }
 0x274   :  { %v2430_v9 = vpop.eup %2429 }
 0x275   :  { %v1784_v10 = vadd.f32 1.0, %v2430_v9 }
 0x277   :  { %2433 = vrcp.f32 %v1784_v10 }
 0x278   :  { %v2432_v11 = vpop.eup %2431 }
 0x279   :  { %v1791_v6 = vadd.f32 1.0, %v2432_v11 }
 0x27b   :  { %2435 = vrcp.f32 %v1791_v6 }
 0x284   :  { %v2434_v12 = vpop.eup %2433 }
 0x285   :  { %v2081_v13 = vpack.c.bf16 %v2434_v12, %v2434_v12 }
 0x287   :  { %1854 = vst.msk [vmem:[#allocation10 + $0x18] sm:$0xf] %vm1853_vm3, %v2081_v13 }
 0x288   :  { %v2436_v5 = vpop.eup %2435 }
 0x289   :  { %v2085_v14 = vpack.c.bf16 %v2436_v5, %v2436_v5 }
 0x28b   :  { %1858 = vst.msk [vmem:[#allocation10 + $0x34] sm:$0xf] %vm1853_vm3, %v2085_v14 }
 0x28c   :  { %2528 = shalt.err (!%p2525_p10)
}
 0x28d   :  { %1870 = dma.vmem_to_hbm [thread:$0]  %s1865_s17, 896, %s2695_s5, [#allocation4], %s2553_s0, %s2553_s0, %s2554_s14  }
 0x28e   :  { %2543 = dma.done.wait [#allocation4], 896  }
 0x28f   :  { %2544 = vsyncadd [#allocation4], 4294966400 }
 0x290   :  { %1874 = vsyncpa [#allocation3], 1 }
 0x291   :  { %1875 = vsyncpa [#allocation6], 1 }
 0x292   :  { %1876 = vsyncpa [#allocation9], 1 }
 0x293   :  { %1877 = vsyncpa [#allocation4], 1 }

</bundles_post_ra>
